<compile_context>
chip_gen: v6e
topology: v6e:2x2x1
jax: 0.10.0
libtpu: 0.0.40
codegen_flags: <defaults>
</compile_context>

<pallas_src>
import functools

import jax
import jax.numpy as jnp
from jax import lax
from jax.experimental import pallas as pl
from jax.experimental.pallas import tpu as pltpu

LAYER_SIZES = (64, 64, 48, 32, 16, 16)  # layer_1 .. layer_6
MID = 64                                # max hidden width; uniform packed-layer width
EPS = 1e-5                              # PyTorch InstanceNorm1d default eps
DEFAULT_TILE_B = 512                    # MXU M rows per grid step (multiple of 8)


def _round_up(x, m):
    return (x + m - 1) // m * m


def _mlp_kernel(x_ref, w1_ref, wmid_ref, w7_ref, bmid_ref, b7_ref, o_ref):
    # ---- InstanceNorm1d over the feature (lane) axis, per sample, in f32 ----
    x = x_ref[...].astype(jnp.float32)
    mu = jnp.mean(x, axis=-1, keepdims=True)
    xc = x - mu
    var = jnp.mean(xc * xc, axis=-1, keepdims=True)          # biased variance (PyTorch)
    h = (xc * lax.rsqrt(var + EPS)).astype(jnp.bfloat16)

    # ---- Layer 1: (tile_b, input_size) @ (input_size, 64) ----
    y = jnp.dot(h, w1_ref[...], preferred_element_type=jnp.float32) + bmid_ref[0:1, :]
    h = jnp.tanh(y).astype(jnp.bfloat16)

    # ---- Layers 2..6: packed (5, 64, 64) slab, static index per unrolled step ----
    for l in range(5):
        y = (jnp.dot(h, wmid_ref[l], preferred_element_type=jnp.float32)
             + bmid_ref[l + 1:l + 2, :])
        h = jnp.tanh(y).astype(jnp.bfloat16)

    # ---- Final layer: plain linear, lane-unpadded output ----
    y = jnp.dot(h, w7_ref[...], preferred_element_type=jnp.float32) + b7_ref[...]
    o_ref[...] = y.astype(o_ref.dtype)


def init_params(key, input_size, output_size):
    """Deterministic PyTorch-style Linear init: U(-1/sqrt(fan_in), 1/sqrt(fan_in))."""
    dims = (input_size,) + LAYER_SIZES + (output_size,)
    ws, bs = [], []
    for i in range(len(dims) - 1):
        fan_in, fan_out = dims[i], dims[i + 1]
        key, kw, kb = jax.random.split(key, 3)
        bound = 1.0 / (fan_in ** 0.5)
        # stored as (in, out) so the kernel does x @ W
        ws.append(jax.random.uniform(kw, (fan_in, fan_out), jnp.float32, -bound, bound))
        bs.append(jax.random.uniform(kb, (1, fan_out), jnp.float32, -bound, bound))
    return ws, bs


def _pack_params(ws, bs):
    """Pack the 7 layers into 5 operands: w1, wmid(5,64,64), w7(64,out), bmid(6,64), b7."""
    w1 = ws[0].astype(jnp.bfloat16)                                   # (input_size, 64)
    wmid = jnp.stack([
        jnp.pad(ws[l + 1],
                ((0, MID - ws[l + 1].shape[0]), (0, MID - ws[l + 1].shape[1])))
        for l in range(5)
    ]).astype(jnp.bfloat16)                                           # (5, 64, 64)
    w7 = jnp.pad(ws[6], ((0, MID - ws[6].shape[0]), (0, 0))).astype(jnp.bfloat16)
    bmid = jnp.stack([
        jnp.pad(bs[l].reshape(-1), (0, MID - bs[l].size)) for l in range(6)
    ]).astype(jnp.float32)                                            # (6, 64)
    b7 = bs[6].reshape(1, -1).astype(jnp.float32)                     # (1, output_size)
    return w1, wmid, w7, bmid, b7


@functools.partial(jax.jit, static_argnames=("tile_b",))
def build_network_large_forward(x, ws, bs, *, tile_b=None):
    """x: (batch, 1, input_size) float32 -> (batch, output_size) float32."""
    batch = x.shape[0]
    input_size = x.shape[-1]
    output_size = ws[-1].shape[-1]
    x2d = x.reshape(batch, input_size).astype(jnp.float32)

    # --- batch tiling: multiple of 8 sublanes, padded so the grid divides exactly ---
    if tile_b is None:
        tile_b = DEFAULT_TILE_B
    tile_b = _round_up(min(tile_b, _round_up(batch, 8)), 8)
    batch_p = _round_up(batch, tile_b)
    if batch_p != batch:
        x2d = jnp.pad(x2d, ((0, batch_p - batch), (0, 0)))

    w1, wmid, w7, bmid, b7 = _pack_params(ws, bs)

    grid = (batch_p // tile_b,)

    x_spec = pl.BlockSpec((tile_b, input_size), lambda i: (i, 0))
    # Params: same block every grid step -> stay VMEM-resident.
    w1_spec = pl.BlockSpec(w1.shape, lambda i: (0, 0))
    wmid_spec = pl.BlockSpec(wmid.shape, lambda i: (0, 0, 0))
    w7_spec = pl.BlockSpec(w7.shape, lambda i: (0, 0))
    bmid_spec = pl.BlockSpec(bmid.shape, lambda i: (0, 0))
    b7_spec = pl.BlockSpec(b7.shape, lambda i: (0, 0))
    # Output block spans the full (unpadded) last dim -> no wasted HBM writeback.
    out_spec = pl.BlockSpec((tile_b, output_size), lambda i: (i, 0))

    flops = 2 * batch_p * (input_size * MID + 5 * MID * MID + MID * output_size)
    transcendentals = batch_p * MID * 6
    bytes_accessed = (batch_p * 4 * (input_size + output_size)
                      + 2 * (w1.size + wmid.size + w7.size)
                      + 4 * (bmid.size + b7.size))

    out = pl.pallas_call(
        _mlp_kernel,
        out_shape=jax.ShapeDtypeStruct((batch_p, output_size), jnp.float32),
        grid=grid,
        in_specs=[x_spec, w1_spec, wmid_spec, w7_spec, bmid_spec, b7_spec],
        out_specs=out_spec,
        compiler_params=pltpu.CompilerParams(
            dimension_semantics=("parallel",),
            vmem_limit_bytes=32 * 1024 * 1024),
        cost_estimate=pl.CostEstimate(
            flops=flops,
            transcendentals=transcendentals,
            bytes_accessed=bytes_accessed),
    )(x2d, w1, wmid, w7, bmid, b7)

    return out[:batch, :]


def reference_forward(x, ws, bs):
    """Pure-JAX reference matching the kernel's bf16-matmul / f32-accumulate arithmetic."""
    batch = x.shape[0]
    h = x.reshape(batch, -1).astype(jnp.float32)
    mu = jnp.mean(h, axis=-1, keepdims=True)
    var = jnp.mean((h - mu) ** 2, axis=-1, keepdims=True)
    h = ((h - mu) / jnp.sqrt(var + EPS)).astype(jnp.bfloat16)
    n = len(ws)
    for i, (w, b) in enumerate(zip(ws, bs)):
        y = jnp.dot(h, w.astype(jnp.bfloat16),
                    preferred_element_type=jnp.float32) + b.reshape(1, -1)
        h = jnp.tanh(y).astype(jnp.bfloat16) if i < n - 1 else y
    return h


if __name__ == "__main__":
    key = jax.random.PRNGKey(0)
    input_size, output_size = 32, 8

    kx, kp = jax.random.split(key)
    ws, bs = init_params(kp, input_size, output_size)

    # Case 1: small batch, single grid step (tile shrinks to the batch).
    x_small = jax.random.normal(kx, (8, 1, input_size), jnp.float32)
    out_small = jax.block_until_ready(build_network_large_forward(x_small, ws, bs))
    ref_small = reference_forward(x_small, ws, bs)
    assert out_small.shape == (8, output_size), out_small.shape
    err = float(jnp.max(jnp.abs(out_small - ref_small)))
    assert jnp.allclose(out_small, ref_small, atol=5e-3, rtol=5e-3), err

    # Case 2: batch not a multiple of the tile -> multi-step grid + padded tail.
    x_big = jax.random.normal(jax.random.PRNGKey(1), (40, 1, input_size), jnp.float32)
    out_big = jax.block_until_ready(
        build_network_large_forward(x_big, ws, bs, tile_b=16))
    ref_big = reference_forward(x_big, ws, bs)
    assert out_big.shape == (40, output_size), out_big.shape
    err = float(jnp.max(jnp.abs(out_big - ref_big)))
    assert jnp.allclose(out_big, ref_big, atol=5e-3, rtol=5e-3), err

    print("KERNEL_OK")
</pallas_src>

<mosaic_0001>
module attributes {stable_mosaic.version = 11 : i64} {
  func.func @_mlp_kernel(%arg0: i32, %arg1: memref<8x32xf32, #tpu.memory_space<vmem>>, %arg2: memref<32x64xbf16, #tpu.memory_space<vmem>>, %arg3: memref<5x64x64xbf16, #tpu.memory_space<vmem>>, %arg4: memref<64x8xbf16, #tpu.memory_space<vmem>>, %arg5: memref<6x64xf32, #tpu.memory_space<vmem>>, %arg6: memref<1x8xf32, #tpu.memory_space<vmem>>, %arg7: memref<8x8xf32, #tpu.memory_space<vmem>>) attributes {dimension_semantics = [#tpu.dimension_semantics<parallel>], iteration_bounds = array<i64: 1>, scalar_prefetch = 0 : i64, scratch_operands = 0 : i64, tpu.core_type = #tpu.core_type<tc>, window_params = [{transform_indices = @transform_0, window_bounds = array<i64: 8, 32>}, {pipeline_mode = #tpu.pipeline_mode<synchronous>, transform_indices = @transform_1, window_bounds = array<i64: 32, 64>}, {pipeline_mode = #tpu.pipeline_mode<synchronous>, transform_indices = @transform_2, window_bounds = array<i64: 5, 64, 64>}, {pipeline_mode = #tpu.pipeline_mode<synchronous>, transform_indices = @transform_3, window_bounds = array<i64: 64, 8>}, {pipeline_mode = #tpu.pipeline_mode<synchronous>, transform_indices = @transform_4, window_bounds = array<i64: 6, 64>}, {pipeline_mode = #tpu.pipeline_mode<synchronous>, transform_indices = @transform_5, window_bounds = array<i64: 1, 8>}, {transform_indices = @transform_6, window_bounds = array<i64: 8, 8>}]} {
    %c0 = arith.constant 0 : index
    %c0_0 = arith.constant 0 : index
    %0 = vector.load %arg1[%c0, %c0_0] : memref<8x32xf32, #tpu.memory_space<vmem>>, vector<8x32xf32>
    %cst = arith.constant dense<0.000000e+00> : vector<8xf32>
    %1 = vector.multi_reduction <add>, %0, %cst [1] : vector<8x32xf32> to vector<8xf32>
    %2 = vector.shape_cast %1 : vector<8xf32> to vector<8x1xf32>
    %cst_1 = arith.constant 3.200000e+01 : f32
    %3 = vector.broadcast %cst_1 : f32 to vector<8x1xf32>
    %4 = arith.divf %2, %3 : vector<8x1xf32>
    %5 = vector.broadcast %4 : vector<8x1xf32> to vector<8x32xf32>
    %6 = arith.subf %0, %5 : vector<8x32xf32>
    %7 = arith.mulf %6, %6 : vector<8x32xf32>
    %cst_2 = arith.constant dense<0.000000e+00> : vector<8xf32>
    %8 = vector.multi_reduction <add>, %7, %cst_2 [1] : vector<8x32xf32> to vector<8xf32>
    %9 = vector.shape_cast %8 : vector<8xf32> to vector<8x1xf32>
    %cst_3 = arith.constant 3.200000e+01 : f32
    %10 = vector.broadcast %cst_3 : f32 to vector<8x1xf32>
    %11 = arith.divf %9, %10 : vector<8x1xf32>
    %cst_4 = arith.constant 9.99999974E-6 : f32
    %12 = vector.broadcast %cst_4 : f32 to vector<8x1xf32>
    %13 = arith.addf %11, %12 : vector<8x1xf32>
    %14 = math.rsqrt %13 : vector<8x1xf32>
    %15 = vector.broadcast %14 : vector<8x1xf32> to vector<8x32xf32>
    %16 = arith.mulf %6, %15 : vector<8x32xf32>
    %17 = arith.truncf %16 : vector<8x32xf32> to vector<8x32xbf16>
    %c0_5 = arith.constant 0 : index
    %c0_6 = arith.constant 0 : index
    %18 = vector.load %arg2[%c0_5, %c0_6] : memref<32x64xbf16, #tpu.memory_space<vmem>>, vector<32x64xbf16>
    %cst_7 = arith.constant dense<0.000000e+00> : vector<8x64xf32>
    %19 = tpu.matmul %17, %18, %cst_7 {dimension_numbers = #tpu.dot_dimension_numbers<[1], [0], [0], [1], [0, 0, 1, 1], [], []>} : vector<8x32xbf16>, vector<32x64xbf16>, vector<8x64xf32> -> vector<8x64xf32>
    %c0_8 = arith.constant 0 : index
    %c0_9 = arith.constant 0 : index
    %20 = vector.load %arg5[%c0_8, %c0_9] : memref<6x64xf32, #tpu.memory_space<vmem>>, vector<1x64xf32>
    %21 = vector.broadcast %20 : vector<1x64xf32> to vector<8x64xf32>
    %22 = arith.addf %19, %21 : vector<8x64xf32>
    %23 = math.tanh %22 : vector<8x64xf32>
    %24 = arith.truncf %23 : vector<8x64xf32> to vector<8x64xbf16>
    %c0_10 = arith.constant 0 : index
    %c0_11 = arith.constant 0 : index
    %c0_12 = arith.constant 0 : index
    %25 = vector.load %arg3[%c0_10, %c0_11, %c0_12] : memref<5x64x64xbf16, #tpu.memory_space<vmem>>, vector<1x64x64xbf16>
    %26 = vector.shape_cast %25 : vector<1x64x64xbf16> to vector<64x64xbf16>
    %cst_13 = arith.constant dense<0.000000e+00> : vector<8x64xf32>
    %27 = tpu.matmul %24, %26, %cst_13 {dimension_numbers = #tpu.dot_dimension_numbers<[1], [0], [0], [1], [0, 0, 1, 1], [], []>} : vector<8x64xbf16>, vector<64x64xbf16>, vector<8x64xf32> -> vector<8x64xf32>
    %c1 = arith.constant 1 : index
    %c0_14 = arith.constant 0 : index
    %28 = vector.load %arg5[%c1, %c0_14] : memref<6x64xf32, #tpu.memory_space<vmem>>, vector<1x64xf32>
    %29 = vector.broadcast %28 : vector<1x64xf32> to vector<8x64xf32>
    %30 = arith.addf %27, %29 : vector<8x64xf32>
    %31 = math.tanh %30 : vector<8x64xf32>
    %32 = arith.truncf %31 : vector<8x64xf32> to vector<8x64xbf16>
    %c1_15 = arith.constant 1 : index
    %c0_16 = arith.constant 0 : index
    %c0_17 = arith.constant 0 : index
    %33 = vector.load %arg3[%c1_15, %c0_16, %c0_17] : memref<5x64x64xbf16, #tpu.memory_space<vmem>>, vector<1x64x64xbf16>
    %34 = vector.shape_cast %33 : vector<1x64x64xbf16> to vector<64x64xbf16>
    %cst_18 = arith.constant dense<0.000000e+00> : vector<8x64xf32>
    %35 = tpu.matmul %32, %34, %cst_18 {dimension_numbers = #tpu.dot_dimension_numbers<[1], [0], [0], [1], [0, 0, 1, 1], [], []>} : vector<8x64xbf16>, vector<64x64xbf16>, vector<8x64xf32> -> vector<8x64xf32>
    %c2 = arith.constant 2 : index
    %c0_19 = arith.constant 0 : index
    %36 = vector.load %arg5[%c2, %c0_19] : memref<6x64xf32, #tpu.memory_space<vmem>>, vector<1x64xf32>
    %37 = vector.broadcast %36 : vector<1x64xf32> to vector<8x64xf32>
    %38 = arith.addf %35, %37 : vector<8x64xf32>
    %39 = math.tanh %38 : vector<8x64xf32>
    %40 = arith.truncf %39 : vector<8x64xf32> to vector<8x64xbf16>
    %c2_20 = arith.constant 2 : index
    %c0_21 = arith.constant 0 : index
    %c0_22 = arith.constant 0 : index
    %41 = vector.load %arg3[%c2_20, %c0_21, %c0_22] : memref<5x64x64xbf16, #tpu.memory_space<vmem>>, vector<1x64x64xbf16>
    %42 = vector.shape_cast %41 : vector<1x64x64xbf16> to vector<64x64xbf16>
    %cst_23 = arith.constant dense<0.000000e+00> : vector<8x64xf32>
    %43 = tpu.matmul %40, %42, %cst_23 {dimension_numbers = #tpu.dot_dimension_numbers<[1], [0], [0], [1], [0, 0, 1, 1], [], []>} : vector<8x64xbf16>, vector<64x64xbf16>, vector<8x64xf32> -> vector<8x64xf32>
    %c3 = arith.constant 3 : index
    %c0_24 = arith.constant 0 : index
    %44 = vector.load %arg5[%c3, %c0_24] : memref<6x64xf32, #tpu.memory_space<vmem>>, vector<1x64xf32>
    %45 = vector.broadcast %44 : vector<1x64xf32> to vector<8x64xf32>
    %46 = arith.addf %43, %45 : vector<8x64xf32>
    %47 = math.tanh %46 : vector<8x64xf32>
    %48 = arith.truncf %47 : vector<8x64xf32> to vector<8x64xbf16>
    %c3_25 = arith.constant 3 : index
    %c0_26 = arith.constant 0 : index
    %c0_27 = arith.constant 0 : index
    %49 = vector.load %arg3[%c3_25, %c0_26, %c0_27] : memref<5x64x64xbf16, #tpu.memory_space<vmem>>, vector<1x64x64xbf16>
    %50 = vector.shape_cast %49 : vector<1x64x64xbf16> to vector<64x64xbf16>
    %cst_28 = arith.constant dense<0.000000e+00> : vector<8x64xf32>
    %51 = tpu.matmul %48, %50, %cst_28 {dimension_numbers = #tpu.dot_dimension_numbers<[1], [0], [0], [1], [0, 0, 1, 1], [], []>} : vector<8x64xbf16>, vector<64x64xbf16>, vector<8x64xf32> -> vector<8x64xf32>
    %c4 = arith.constant 4 : index
    %c0_29 = arith.constant 0 : index
    %52 = vector.load %arg5[%c4, %c0_29] : memref<6x64xf32, #tpu.memory_space<vmem>>, vector<1x64xf32>
    %53 = vector.broadcast %52 : vector<1x64xf32> to vector<8x64xf32>
    %54 = arith.addf %51, %53 : vector<8x64xf32>
    %55 = math.tanh %54 : vector<8x64xf32>
    %56 = arith.truncf %55 : vector<8x64xf32> to vector<8x64xbf16>
    %c4_30 = arith.constant 4 : index
    %c0_31 = arith.constant 0 : index
    %c0_32 = arith.constant 0 : index
    %57 = vector.load %arg3[%c4_30, %c0_31, %c0_32] : memref<5x64x64xbf16, #tpu.memory_space<vmem>>, vector<1x64x64xbf16>
    %58 = vector.shape_cast %57 : vector<1x64x64xbf16> to vector<64x64xbf16>
    %cst_33 = arith.constant dense<0.000000e+00> : vector<8x64xf32>
    %59 = tpu.matmul %56, %58, %cst_33 {dimension_numbers = #tpu.dot_dimension_numbers<[1], [0], [0], [1], [0, 0, 1, 1], [], []>} : vector<8x64xbf16>, vector<64x64xbf16>, vector<8x64xf32> -> vector<8x64xf32>
    %c5 = arith.constant 5 : index
    %c0_34 = arith.constant 0 : index
    %60 = vector.load %arg5[%c5, %c0_34] : memref<6x64xf32, #tpu.memory_space<vmem>>, vector<1x64xf32>
    %61 = vector.broadcast %60 : vector<1x64xf32> to vector<8x64xf32>
    %62 = arith.addf %59, %61 : vector<8x64xf32>
    %63 = math.tanh %62 : vector<8x64xf32>
    %64 = arith.truncf %63 : vector<8x64xf32> to vector<8x64xbf16>
    %c0_35 = arith.constant 0 : index
    %c0_36 = arith.constant 0 : index
    %65 = vector.load %arg4[%c0_35, %c0_36] : memref<64x8xbf16, #tpu.memory_space<vmem>>, vector<64x8xbf16>
    %cst_37 = arith.constant dense<0.000000e+00> : vector<8x8xf32>
    %66 = tpu.matmul %64, %65, %cst_37 {dimension_numbers = #tpu.dot_dimension_numbers<[1], [0], [0], [1], [0, 0, 1, 1], [], []>} : vector<8x64xbf16>, vector<64x8xbf16>, vector<8x8xf32> -> vector<8x8xf32>
    %c0_38 = arith.constant 0 : index
    %c0_39 = arith.constant 0 : index
    %67 = vector.load %arg6[%c0_38, %c0_39] : memref<1x8xf32, #tpu.memory_space<vmem>>, vector<1x8xf32>
    %68 = vector.broadcast %67 : vector<1x8xf32> to vector<8x8xf32>
    %69 = arith.addf %66, %68 : vector<8x8xf32>
    %c0_40 = arith.constant 0 : index
    %c0_41 = arith.constant 0 : index
    %70 = vector.load %arg7[%c0_40, %c0_41] : memref<8x8xf32, #tpu.memory_space<vmem>>, vector<8x8xf32>
    tpu.vector_store %arg7[%c0_40, %c0_41], %69 {strides = array<i32>} : memref<8x8xf32, #tpu.memory_space<vmem>>, vector<8x8xf32>,
    return
  }
  func.func @transform_0(%arg0: i32) -> (i32, i32) {
    %c0_i32 = arith.constant 0 : i32
    %c0_i32_0 = arith.constant 0 : i32
    return %arg0, %c0_i32 : i32, i32
  }
  func.func @transform_1(%arg0: i32) -> (i32, i32) {
    %c0_i32 = arith.constant 0 : i32
    %c0_i32_0 = arith.constant 0 : i32
    %c0_i32_1 = arith.constant 0 : i32
    return %c0_i32, %c0_i32_0 : i32, i32
  }
  func.func @transform_2(%arg0: i32) -> (i32, i32, i32) {
    %c0_i32 = arith.constant 0 : i32
    %c0_i32_0 = arith.constant 0 : i32
    %c0_i32_1 = arith.constant 0 : i32
    %c0_i32_2 = arith.constant 0 : i32
    return %c0_i32, %c0_i32_0, %c0_i32_1 : i32, i32, i32
  }
  func.func @transform_3(%arg0: i32) -> (i32, i32) {
    %c0_i32 = arith.constant 0 : i32
    %c0_i32_0 = arith.constant 0 : i32
    %c0_i32_1 = arith.constant 0 : i32
    return %c0_i32, %c0_i32_0 : i32, i32
  }
  func.func @transform_4(%arg0: i32) -> (i32, i32) {
    %c0_i32 = arith.constant 0 : i32
    %c0_i32_0 = arith.constant 0 : i32
    %c0_i32_1 = arith.constant 0 : i32
    return %c0_i32, %c0_i32_0 : i32, i32
  }
  func.func @transform_5(%arg0: i32) -> (i32, i32) {
    %c0_i32 = arith.constant 0 : i32
    %c0_i32_0 = arith.constant 0 : i32
    %c0_i32_1 = arith.constant 0 : i32
    return %c0_i32, %c0_i32_0 : i32, i32
  }
  func.func @transform_6(%arg0: i32) -> (i32, i32) {
    %c0_i32 = arith.constant 0 : i32
    %c0_i32_0 = arith.constant 0 : i32
    return %arg0, %c0_i32 : i32, i32
  }
}

</mosaic_0001>

<bundles_post_ra>
// kernel: build_network_large_forward.1
= control target key start
LH: loop header
LB: loop body
LE: loop exit
PB: predicated region body
PF: predicated region fallthrough
CT: control target
= control target key end

     0   :  { %vm26_vm0 = vcmask 261120   ;;  %s1063_s0 = inlined_call_operand.vmem [shape: f32[8,32], index: 0, kind: input, shape index: {}]   ;;  %s1064_s1 = inlined_call_operand.vmem [shape: bf16[32,64], index: 1, kind: input, shape index: {}]   ;;  %s1065_s2 = inlined_call_operand.vmem [shape: bf16[5,64,64], index: 2, kind: input, shape index: {}]   ;;  %s1066_s3 = inlined_call_operand.vmem [shape: bf16[64,8], index: 3, kind: input, shape index: {}]   ;;  %s1067_s4 = inlined_call_operand.vmem [shape: f32[6,64], index: 4, kind: input, shape index: {}]   ;;  %s1068_s5 = inlined_call_operand.vmem [shape: f32[1,8], index: 5, kind: input, shape index: {}]   ;;  %s1069_s6 = inlined_call_operand.hbm [shape: f32[8,8], index: 6, kind: output, shape index: {}]  }
   0x1   :  { %v25_v0 = vld [vmem:[%s1063_s0] sm:$0xff] }
   0x2   :  { %v27_v1 = vsel %vm26_vm0, %v25_v0, 0.0 }
   0x3   :  { %28 = vadd.xlane.f32.xlu0 %v27_v1 }
   0x4   :  { %11 = vsyncpa [#allocation3], 0  ;;  %v809_v7 = vld [vmem:[%s1064_s1 + $0x8] sm:$0xff]   ;;  %v871_v8 = vmov 0.0   ;;  %vm872_vm1 = vmmov 0   ;;  %v810_v9 = vld [vmem:[%s1064_s1] sm:$0xff]  }
   0x5   :  { %726 = vmatprep.subr.bf16.mxu0 %v871_v8  ;;  %730 = vmatprep.mubr.msk.bf16.mxu0 %vm872_vm1, %v871_v8  ;;  %v811_v16 = vld [vmem:[%s1065_s2 + $0x18] sm:$0xff]   ;;  %v812_v17 = vld [vmem:[%s1065_s2 + $0x10] sm:$0xff]   ;;  %v813_v18 = vld [vmem:[%s1065_s2 + $0x8] sm:$0xff]   ;;  %vm145_vm2 = vcmask 523264   ;;  %vm605_vm3 = vcmask 64512  }
   0x6   :  { %727 = vmatpush3.bf16.msra.mxu0 %v809_v7  ;;  %734 = vmatprep.subr.bf16.mxu1 %v871_v8  ;;  %v814_v19 = vld [vmem:[%s1065_s2] sm:$0xff]   ;;  %v815_v28 = vld [vmem:[%s1065_s2 + $0x38] sm:$0xff]   ;;  %v816_v29 = vld [vmem:[%s1065_s2 + $0x30] sm:$0xff]  }
   0x7   :  { %728 = vmatprep.subr.bf16.mxu0 %v871_v8  ;;  %742 = vmatprep.mubr.msk.bf16.mxu1 %vm872_vm1, %v871_v8  ;;  %v621_v20 = vld [vmem:[%s1067_s4] ss:$0 sm:$0xff]  ;;  %v817_v30 = vld [vmem:[%s1065_s2 + $0x28] sm:$0xff]   ;;  %v625_v32 = vld [vmem:[%s1067_s4 + $0x1] ss:$0 sm:$0xff] }
   0x8   :  { %735 = vmatpush3.bf16.msra.mxu1 %v811_v16  ;;  %v818_v31 = vld [vmem:[%s1065_s2 + $0x20] sm:$0xff]   ;;  %v819_v40 = vld [vmem:[%s1065_s2 + $0x58] sm:$0xff]   ;;  %v820_v41 = vld [vmem:[%s1065_s2 + $0x50] sm:$0xff]  }
   0x9   :  { %736 = vmatprep.subr.bf16.mxu1 %v871_v8  ;;  %v821_v42 = vld [vmem:[%s1065_s2 + $0x48] sm:$0xff]   ;;  %v822_v43 = vld [vmem:[%s1065_s2 + $0x40] sm:$0xff]   ;;  %v823_v52 = vld [vmem:[%s1065_s2 + $0x78] sm:$0xff]  }
   0xa   :  { %729 = vmatpush3.bf16.msra.mxu0 %v810_v9  ;;  %v639_v44 = vld [vmem:[%s1067_s4 + $0x2] ss:$0 sm:$0xff]  ;;  %v824_v53 = vld [vmem:[%s1065_s2 + $0x70] sm:$0xff]   ;;  %v825_v54 = vld [vmem:[%s1065_s2 + $0x68] sm:$0xff]  }
   0xb   :  { %746 = vmatprep.subr.bf16.mxu0 %v871_v8  ;;  %v826_v55 = vld [vmem:[%s1065_s2 + $0x60] sm:$0xff]   ;;  %v828_v1 = vld [vmem:[%s1065_s2 + $0x90] sm:$0xff]  }
   0xc   :  { %737 = vmatpush3.bf16.msra.mxu1 %v812_v17  ;;  %v653_v56 = vld [vmem:[%s1067_s4 + $0x3] ss:$0 sm:$0xff]  ;;  %v681_v17 = vld [vmem:[%s1067_s4 + $0x5] ss:$0 sm:$0xff] }
   0xd   :  { %738 = vmatprep.subr.bf16.mxu1 %v871_v8  ;;  %v834_v16 = vld [vmem:[%s1066_s3] sm:$0xff]  }
  0x10   :  { %739 = vmatpush3.bf16.msra.mxu1 %v813_v18 }
  0x11   :  { %740 = vmatprep.subr.bf16.mxu1 %v871_v8 }
  0x14   :  { %741 = vmatpush3.bf16.msra.mxu1 %v814_v19 }
  0x15   :  { %758 = vmatprep.subr.bf16.mxu1 %v871_v8 }
  0x8c   :  { %v29_v2 = vpop.xlane.xlu0 %28 }
  0x8d   :  { %v31_v3 = vmul.f32 0.03125, %v29_v2  ;;  %v829_v2 = vld [vmem:[%s1065_s2 + $0x88] sm:$0xff]  }
  0x8f   :  { %v32_v4 = vsub.f32 %v25_v0, %v31_v3  ;;  %v827_v0 = vld [vmem:[%s1065_s2 + $0x98] sm:$0xff]   ;;  %v830_v3 = vld [vmem:[%s1065_s2 + $0x80] sm:$0xff]  }
  0x91   :  { %v33_v5 = vmul.f32 %v32_v4, %v32_v4 }
  0x93   :  { %v34_v6 = vsel %vm26_vm0, %v33_v5, 0.0 }
  0x94   :  { %35 = vadd.xlane.f32.xlu0 %v34_v6 }
 0x11d   :  { %v36_v10 = vpop.xlane.xlu0 %35 }
 0x11e   :  { %v37_v11 = vmul.f32 0.03125, %v36_v10 }
 0x120   :  { %v38_v12 = vadd.f32 1e-05, %v37_v11 }
 0x122   :  { %835 = vrsqrt.f32 %v38_v12 }
 0x12f   :  { %v836_v13 = vpop.eup %835 }
 0x130   :  { %v40_v14 = vmul.f32 %v836_v13, %v32_v4  ;;  %v667_v4 = vld [vmem:[%s1067_s4 + $0x4] ss:$0 sm:$0xff]  ;;  %v831_v13 = vld [vmem:[%s1066_s3 + $0x18] sm:$0xff]  }
 0x132   :  { %v41_v15 = vpack.c.bf16 %v40_v14, %v40_v14  ;;  %v832_v14 = vld [vmem:[%s1066_s3 + $0x10] sm:$0xff]  }
 0x134   :  { %731 = vmatmul.mubr.msk.bf16.vlgmr.msra.gmra.mxu0 %vm26_vm0, %v41_v15  ;;  %v833_v15 = vld [vmem:[%s1066_s3 + $0x8] sm:$0xff]   ;;  %s873_s3 = smov [#allocation2]  }
 0x135   :  { %754 = vmatprep.mubr.msk.bf16.mxu0 %vm872_vm1, %v871_v8  ;;  %747 = vmatpush3.bf16.msra.mxu0 %v815_v28  ;;  %s613_s10 = sshll.u32 %s873_s3, 4  ;;  %s614_s10 = int_to_ptr.vmem [resolvable:$true] %s613_s10 }
 0x136   :  { %748 = vmatprep.subr.bf16.mxu0 %v871_v8  ;;  %s849_s4 = scalar_lea.vmem %s614_s10, 128  ;;  %p854_p1 = scmp.lt.s32.totalorder %s614_s10, %s614_s10 }
 0x137   :  { %p850_p0 = scmp.ne.s32.totalorder %s614_s10, %s849_s4  ;;  %p855_p2 = scmp.lt.s32.totalorder %s849_s4, %s849_s4 }
 0x139   :  { %749 = vmatpush3.bf16.msra.mxu0 %v816_v29  ;;  %p856_p3 = por %p855_p2, %p854_p1 }
 0x13a   :  { %750 = vmatprep.subr.bf16.mxu0 %v871_v8 }
 0x13b   :  { %p857_p4 = pnand %p856_p3, %p850_p0 }
 0x13d   :  { %751 = vmatpush3.bf16.msra.mxu0 %v817_v30 }
 0x13e   :  { %752 = vmatprep.subr.bf16.mxu0 %v871_v8 }
 0x141   :  { %753 = vmatpush3.bf16.msra.mxu0 %v818_v31 }
 0x142   :  { %770 = vmatprep.subr.bf16.mxu0 %v871_v8 }
 0x1f4   :  { %v100_v21 = vpop.f32.mrf.mxu0 }
 0x1f5   :  { %v101_v22 = vadd.f32 %v621_v20, %v100_v21 }
 0x1f6   :  { %v732_v23 = vpop.f32.mrf.mxu0 }
 0x1f7   :  { %837 = vtanh.f32 %v101_v22 }
 0x1f8   :  { %v103_v24 = vpop.f32.mrf.mxu0 }
 0x1fa   :  { %v733_v25 = vpop.f32.mrf.mxu0 }
 0x204   :  { %v838_v26 = vpop.eup %837 }
 0x205   :  { %v107_v27 = vpack.c.bf16 %v838_v26, %v838_v26 }
 0x207   :  { %743 = vmatmul.mubr.msk.bf16.vlgmr.msra.gmra.mxu1 %vm145_vm2, %v107_v27 }
 0x208   :  { %766 = vmatprep.mubr.msk.bf16.mxu1 %vm872_vm1, %v871_v8  ;;  %759 = vmatpush3.bf16.msra.mxu1 %v819_v40 }
 0x209   :  { %760 = vmatprep.subr.bf16.mxu1 %v871_v8 }
 0x20c   :  { %761 = vmatpush3.bf16.msra.mxu1 %v820_v41 }
 0x20d   :  { %762 = vmatprep.subr.bf16.mxu1 %v871_v8 }
 0x210   :  { %763 = vmatpush3.bf16.msra.mxu1 %v821_v42 }
 0x211   :  { %764 = vmatprep.subr.bf16.mxu1 %v871_v8 }
 0x214   :  { %765 = vmatpush3.bf16.msra.mxu1 %v822_v43 }
 0x215   :  { %782 = vmatprep.subr.bf16.mxu1 %v871_v8 }
 0x2c7   :  { %v183_v33 = vpop.f32.mrf.mxu1 }
 0x2c8   :  { %v184_v34 = vadd.f32 %v625_v32, %v183_v33 }
 0x2c9   :  { %v744_v35 = vpop.f32.mrf.mxu1 }
 0x2ca   :  { %839 = vtanh.f32 %v184_v34 }
 0x2cb   :  { %v186_v36 = vpop.f32.mrf.mxu1 }
 0x2cd   :  { %v745_v37 = vpop.f32.mrf.mxu1 }
 0x2d7   :  { %v840_v38 = vpop.eup %839 }
 0x2d8   :  { %v190_v39 = vpack.c.bf16 %v840_v38, %v840_v38 }
 0x2da   :  { %755 = vmatmul.mubr.msk.bf16.vlgmr.msra.gmra.mxu0 %vm145_vm2, %v190_v39 }
 0x2db   :  { %778 = vmatprep.mubr.msk.bf16.mxu0 %vm872_vm1, %v871_v8  ;;  %771 = vmatpush3.bf16.msra.mxu0 %v823_v52 }
 0x2dc   :  { %772 = vmatprep.subr.bf16.mxu0 %v871_v8 }
 0x2df   :  { %773 = vmatpush3.bf16.msra.mxu0 %v824_v53 }
 0x2e0   :  { %774 = vmatprep.subr.bf16.mxu0 %v871_v8 }
 0x2e3   :  { %775 = vmatpush3.bf16.msra.mxu0 %v825_v54 }
 0x2e4   :  { %776 = vmatprep.subr.bf16.mxu0 %v871_v8 }
 0x2e7   :  { %777 = vmatpush3.bf16.msra.mxu0 %v826_v55 }
 0x2e8   :  { %794 = vmatprep.subr.bf16.mxu0 %v871_v8 }
 0x39a   :  { %v266_v45 = vpop.f32.mrf.mxu0 }
 0x39b   :  { %v267_v46 = vadd.f32 %v639_v44, %v266_v45 }
 0x39c   :  { %v756_v47 = vpop.f32.mrf.mxu0 }
 0x39d   :  { %841 = vtanh.f32 %v267_v46 }
 0x39e   :  { %v269_v48 = vpop.f32.mrf.mxu0 }
 0x3a0   :  { %v757_v49 = vpop.f32.mrf.mxu0 }
 0x3aa   :  { %v842_v50 = vpop.eup %841 }
 0x3ab   :  { %v273_v51 = vpack.c.bf16 %v842_v50, %v842_v50 }
 0x3ad   :  { %767 = vmatmul.mubr.msk.bf16.vlgmr.msra.gmra.mxu1 %vm145_vm2, %v273_v51 }
 0x3ae   :  { %790 = vmatprep.mubr.msk.bf16.mxu1 %vm872_vm1, %v871_v8  ;;  %783 = vmatpush3.bf16.msra.mxu1 %v827_v0 }
 0x3af   :  { %784 = vmatprep.subr.bf16.mxu1 %v871_v8 }
 0x3b2   :  { %785 = vmatpush3.bf16.msra.mxu1 %v828_v1 }
 0x3b3   :  { %786 = vmatprep.subr.bf16.mxu1 %v871_v8 }
 0x3b6   :  { %787 = vmatpush3.bf16.msra.mxu1 %v829_v2 }
 0x3b7   :  { %788 = vmatprep.subr.bf16.mxu1 %v871_v8 }
 0x3ba   :  { %789 = vmatpush3.bf16.msra.mxu1 %v830_v3 }
 0x46d   :  { %v349_v57 = vpop.f32.mrf.mxu1 }
 0x46e   :  { %v350_v58 = vadd.f32 %v653_v56, %v349_v57 }
 0x46f   :  { %v768_v59 = vpop.f32.mrf.mxu1 }
 0x470   :  { %843 = vtanh.f32 %v350_v58 }
 0x471   :  { %v352_v60 = vpop.f32.mrf.mxu1 }
 0x473   :  { %v769_v61 = vpop.f32.mrf.mxu1 }
 0x47d   :  { %v844_v62 = vpop.eup %843 }
 0x47e   :  { %v356_v63 = vpack.c.bf16 %v844_v62, %v844_v62 }
 0x480   :  { %779 = vmatmul.mubr.msk.bf16.vlgmr.msra.gmra.mxu0 %vm145_vm2, %v356_v63 }
 0x481   :  { %802 = vmatprep.mubr.msk.bf16.mxu0 %vm872_vm1, %v871_v8  ;;  %795 = vmatpush3.bf16.msra.mxu0 %v831_v13 }
 0x482   :  { %796 = vmatprep.subr.bf16.mxu0 %v871_v8 }
 0x485   :  { %797 = vmatpush3.bf16.msra.mxu0 %v832_v14 }
 0x486   :  { %798 = vmatprep.subr.bf16.mxu0 %v871_v8 }
 0x489   :  { %799 = vmatpush3.bf16.msra.mxu0 %v833_v15 }
 0x48a   :  { %800 = vmatprep.subr.bf16.mxu0 %v871_v8  ;;  %v687_v8 = vld [vmem:[%s1068_s5] ss:$0 sm:$0xff] }
 0x48d   :  { %801 = vmatpush3.bf16.msra.mxu0 %v834_v16 }
 0x540   :  { %v432_v5 = vpop.f32.mrf.mxu0 }
 0x541   :  { %v433_v6 = vadd.f32 %v667_v4, %v432_v5 }
 0x542   :  { %v780_v7 = vpop.f32.mrf.mxu0 }
 0x543   :  { %845 = vtanh.f32 %v433_v6 }
 0x544   :  { %v435_v9 = vpop.f32.mrf.mxu0 }
 0x546   :  { %v781_v10 = vpop.f32.mrf.mxu0 }
 0x550   :  { %v846_v11 = vpop.eup %845 }
 0x551   :  { %v439_v12 = vpack.c.bf16 %v846_v11, %v846_v11 }
 0x553   :  { %791 = vmatmul.mubr.msk.bf16.vlgmr.msra.gmra.mxu1 %vm145_vm2, %v439_v12 }
 0x613   :  { %v515_v18 = vpop.f32.mrf.mxu1 }
 0x614   :  { %v516_v19 = vadd.f32 %v681_v17, %v515_v18 }
 0x615   :  { %v792_v20 = vpop.f32.mrf.mxu1 }
 0x616   :  { %847 = vtanh.f32 %v516_v19 }
 0x617   :  { %v518_v21 = vpop.f32.mrf.mxu1 }
 0x619   :  { %v793_v22 = vpop.f32.mrf.mxu1 }
 0x623   :  { %v848_v23 = vpop.eup %847 }
 0x624   :  { %v522_v24 = vpack.c.bf16 %v848_v23, %v848_v23 }
 0x626   :  { %803 = vmatmul.mubr.msk.bf16.vlgmr.msra.gmra.mxu0 %vm145_vm2, %v522_v24 }
 0x6e6   :  { %v599_v25 = vpop.f32.mrf.mxu0 }
 0x6e7   :  { %v600_v26 = vadd.f32 %v687_v8, %v599_v25 }
 0x6e8   :  { %v804_v27 = vpop.f32.mrf.mxu0 }
 0x6e9   :  { %606 = vst.msk [vmem:[#allocation2] sm:$0xff] %vm605_vm3, %v600_v26 }
 0x6ea   :  { %v602_v28 = vpop.f32.mrf.mxu0 }
 0x6eb   :  { %860 = shalt.err (!%p857_p4)
}
 0x6ec   :  { %616 = dma.vmem_to_hbm [thread:$0]  %s614_s10, 128, %s1069_s6, [#allocation3]   ;;  %v805_v29 = vpop.f32.mrf.mxu0 }
 0x6ed   :  { %869 = dma.done.wait [#allocation3], 128  }
 0x6ee   :  { %870 = vsyncadd [#allocation3], 4294967168 }
 0x6ef   :  { %620 = vsyncpa [#allocation3], 1 }

</bundles_post_ra>
